<compile_context>
chip_gen: v7x
topology: tpu7x:2x2x1
jax: 0.10.0
libtpu: 0.0.40
codegen_flags: <defaults>
</compile_context>

<pallas_src>
import jax
import jax.numpy as jnp
from jax.experimental import pallas as pl
from jax.experimental.pallas import tpu as pltpu


def _round_up(x, m):
    return (x + m - 1) // m * m


def _make_kernel(*, linear_num, activation, mxu_bf16):
    def kernel(*refs):
        if linear_num == 1:
            a_ref, b_ref, w_ref, bias_ref, out_ref = refs
        else:
            a_ref, b_ref, w1_ref, b1_ref, w2_ref, b2_ref, out_ref = refs

        # features = |u - v| (VPU elementwise); inputs stream in native dtype
        # (bf16 halves the dominant HBM read) and are upcast in-register.
        feats = jnp.abs(a_ref[...].astype(jnp.float32)
                        - b_ref[...].astype(jnp.float32))              # [TB, D]

        if linear_num == 1:
            # Degenerate [D,1] projection: VPU multiply + cross-lane reduce
            # against a lane-dense [1, D] weight row (no MXU).
            out = jnp.sum(feats * w_ref[...], axis=-1, keepdims=True)  # [TB, 1]
            out = out + bias_ref[0]                                    # SMEM scalar
        else:
            # Hidden projection is a real [TB,D]@[D,D] matmul -> MXU.
            # bf16 operands + f32 accumulate (native MXU rate on v5e/v6e/v7x).
            lhs = feats.astype(jnp.bfloat16) if mxu_bf16 else feats
            h = jnp.dot(lhs, w1_ref[...], preferred_element_type=jnp.float32)
            h = jax.nn.sigmoid(h + b1_ref[...])                        # [TB, D]
            # Final [D,1] projection: VPU multiply + lane reduce again.
            out = jnp.sum(h * w2_ref[...], axis=-1, keepdims=True)     # [TB, 1]
            out = out + b2_ref[0]                                      # SMEM scalar

        if activation == "tanh":
            out = jnp.tanh(out)
        elif activation == "sigmoid":
            out = jax.nn.sigmoid(out)

        # TODO(synk): a lane-dense [1, TB] output layout would avoid masked
        # vst.msk stores in this epilogue; negligible next to the HBM-bound
        # embedding streams, so the simple [TB, 1] store is kept.
        out_ref[...] = out.astype(out_ref.dtype)

    return kernel


def _choose_tile_rows(B, D, itemsize, sublane, tile_rows):
    """Pick the batch tile: ~4 MiB per input tile, >=2 grid tiles when possible."""
    if tile_rows is not None:
        tb = int(tile_rows)
    else:
        target_tile_bytes = 4 << 20          # ~4 MiB per input tile (amortize DMA)
        stream_budget = 24 << 20             # 2 inputs x 2 pipeline buffers
        tb = max(sublane, target_tile_bytes // max(D * itemsize, 1))
        tb = min(tb, max(sublane, stream_budget // max(4 * D * itemsize, 1)))
    # Guarantee >= 2 grid tiles when the batch allows (v7x megacore split).
    tb = min(tb, _round_up(pl.cdiv(B, 2), sublane))
    tb = max(tb, sublane)
    tb = min(tb, _round_up(B, sublane))
    return _round_up(tb, sublane)


def custom_distance_mse_loss(rep_a, rep_b, labels, params, *,
                             num_labels=1, activation=None, linear_num=1,
                             tile_rows=None, mxu_bf16=True,
                             vmem_limit_bytes=None):
    """Returns (loss, output), matching the PyTorch module when labels are given.

    Weight layouts (pre-transposed so the kernel does feats @ W):
      linear_num == 1: params = {"w": [D] / [D,1] / [1,D], "b": scalar / [1]}
      linear_num == 2: params = {"w1": [D,D] ([in,out]), "b1": [D],
                                 "w2": [D] / [D,1],      "b2": scalar / [1]}
    """
    if num_labels != 1:
        # The PyTorch loss (output [B,L] vs labels.view(-1)) only broadcasts
        # sensibly for num_labels == 1; anything else is not torch-faithful.
        raise NotImplementedError("faithful broadcast MSE requires num_labels == 1")
    if linear_num not in (1, 2):
        raise ValueError("linear_num must be 1 or 2")
    if activation not in (None, "tanh", "sigmoid"):
        raise ValueError("activation must be None, 'tanh' or 'sigmoid'")
    if rep_a.shape != rep_b.shape:
        raise ValueError("rep_a / rep_b shape mismatch")

    B, D = rep_a.shape
    itemsize = jnp.dtype(rep_a.dtype).itemsize
    sublane = max(8, 32 // itemsize)           # f32: 8, bf16: 16, int8/fp8: 32

    tb = _choose_tile_rows(B, D, itemsize, sublane, tile_rows)
    n_tiles = pl.cdiv(B, tb)                   # ragged last block handled by Pallas

    row_spec = pl.BlockSpec((tb, D), lambda i: (i, 0))     # streamed embeddings
    rep_spec = pl.BlockSpec((1, D), lambda i: (0, 0))      # replicated weight rows
    smem_spec = pl.BlockSpec(memory_space=pltpu.MemorySpace.SMEM)

    if linear_num == 1:
        w_row = jnp.asarray(params["w"], jnp.float32).reshape(1, D)
        bias = jnp.asarray(params["b"], jnp.float32).reshape(1,)
        inputs = (rep_a, rep_b, w_row, bias)
        in_specs = [row_spec, row_spec, rep_spec, smem_spec]
        w_resident = 0
        flops = 3 * B * D
        trans = 0
    else:
        w1_dtype = jnp.bfloat16 if mxu_bf16 else jnp.float32
        w1 = jnp.asarray(params["w1"]).astype(w1_dtype)                 # [D, D]
        b1 = jnp.asarray(params["b1"], jnp.float32).reshape(1, D)
        w2 = jnp.asarray(params["w2"], jnp.float32).reshape(1, D)
        b2 = jnp.asarray(params["b2"], jnp.float32).reshape(1,)
        inputs = (rep_a, rep_b, w1, b1, w2, b2)
        # TODO(synk): for D >= 2048 on v7x (64 MiB physical VMEM) tile w1 over a
        # second grid axis (output columns / K) instead of holding the full
        # [D,D] block resident.
        in_specs = [row_spec, row_spec,
                    pl.BlockSpec((D, D), lambda i: (0, 0)),
                    rep_spec, rep_spec, smem_spec]
        w_resident = 2 * D * D * jnp.dtype(w1_dtype).itemsize + 4 * D * 4
        flops = 3 * B * D + 2 * B * D * D + 3 * B * D
        trans = B * D
    if activation is not None:
        trans += B

    # VMEM residency: 2 input streams x 2 pipeline buffers + resident weights
    # + small output double-buffer + slack for compiler scratch.
    vmem_needed = 4 * tb * D * itemsize + w_resident + 4 * tb * 4 + (2 << 20)
    if vmem_limit_bytes is None:
        vmem_limit_bytes = int(min(max(vmem_needed + (4 << 20), 16 << 20), 64 << 20))

    cost = pl.CostEstimate(
        flops=int(flops),
        transcendentals=int(trans),
        bytes_accessed=int(2 * B * D * itemsize + w_resident + B * 4))

    kernel = _make_kernel(linear_num=linear_num, activation=activation,
                          mxu_bf16=mxu_bf16)

    output = pl.pallas_call(
        kernel,
        grid=(n_tiles,),
        in_specs=in_specs,
        out_specs=pl.BlockSpec((tb, 1), lambda i: (i, 0)),
        out_shape=jax.ShapeDtypeStruct((B, 1), jnp.float32),
        compiler_params=pltpu.CompilerParams(
            dimension_semantics=("parallel",),
            vmem_limit_bytes=vmem_limit_bytes),
        cost_estimate=cost,
    )(*inputs)

    # Tiny O(B) loss reduction in the wrapper (exact torch broadcast MSE value):
    #   mean_{i,j}(o_i - l_j)^2 = mean((o-c)^2) + mean((l-c)^2),  c = mean(l)
    o = output[:, 0].astype(jnp.float32)
    lab = labels.reshape(-1).astype(jnp.float32)
    c = jnp.mean(lab)
    loss = jnp.mean(jnp.square(o - c)) + jnp.mean(jnp.square(lab - c))
    return loss, output


def _reference(rep_a, rep_b, labels, params, *, activation=None, linear_num=1):
    """Pure-JAX f32 reference with the faithful (torch-style broadcast) MSE."""
    feats = jnp.abs(rep_a.astype(jnp.float32) - rep_b.astype(jnp.float32))
    D = feats.shape[1]
    if linear_num == 1:
        out = feats @ jnp.asarray(params["w"], jnp.float32).reshape(D, 1)
        out = out + jnp.asarray(params["b"], jnp.float32).reshape(1, 1)
    else:
        h = jax.nn.sigmoid(feats @ jnp.asarray(params["w1"], jnp.float32)
                           + jnp.asarray(params["b1"], jnp.float32).reshape(1, D))
        out = h @ jnp.asarray(params["w2"], jnp.float32).reshape(D, 1)
        out = out + jnp.asarray(params["b2"], jnp.float32).reshape(1, 1)
    if activation == "tanh":
        out = jnp.tanh(out)
    elif activation == "sigmoid":
        out = jax.nn.sigmoid(out)
    lab = labels.reshape(-1).astype(jnp.float32)
    diff = out - lab[None, :]            # [B,1] vs [B] -> [B,B] (torch broadcast)
    return jnp.mean(diff * diff), out


if __name__ == "__main__":
    def linear_init(key, fan_in, shape):
        bound = 1.0 / jnp.sqrt(jnp.float32(fan_in))
        return jax.random.uniform(key, shape, minval=-bound, maxval=bound,
                                  dtype=jnp.float32)

    key = jax.random.PRNGKey(0)
    k = jax.random.split(key, 8)

    # --- test 1: linear_num=1, no activation, single tile, f32 --------------
    B, D = 8, 64
    rep_a = jax.random.normal(k[0], (B, D), jnp.float32)
    rep_b = jax.random.normal(k[1], (B, D), jnp.float32)
    labels = jax.random.uniform(k[2], (B,), dtype=jnp.float32)
    params1 = {"w": linear_init(k[3], D, (D, 1)), "b": linear_init(k[4], D, (1,))}
    loss, out = custom_distance_mse_loss(rep_a, rep_b, labels, params1,
                                         activation=None, linear_num=1)
    jax.block_until_ready((loss, out))
    ref_loss, ref_out = _reference(rep_a, rep_b, labels, params1,
                                   activation=None, linear_num=1)
    assert jnp.allclose(out, ref_out, atol=1e-5, rtol=1e-5), "output mismatch (t1)"
    assert jnp.allclose(loss, ref_loss, atol=1e-5, rtol=1e-4), "loss mismatch (t1)"

    # --- test 2: linear_num=1, sigmoid, multi-tile grid + ragged last block --
    B2, D2 = 20, 64
    rep_a2 = jax.random.normal(k[5], (B2, D2), jnp.float32)
    rep_b2 = jax.random.normal(k[6], (B2, D2), jnp.float32)
    labels2 = jax.random.uniform(k[7], (B2,), dtype=jnp.float32)
    params2 = {"w": linear_init(k[3], D2, (D2, 1)), "b": linear_init(k[4], D2, (1,))}
    loss2, out2 = custom_distance_mse_loss(rep_a2, rep_b2, labels2, params2,
                                           activation="sigmoid", linear_num=1,
                                           tile_rows=8)
    jax.block_until_ready((loss2, out2))
    ref_loss2, ref_out2 = _reference(rep_a2, rep_b2, labels2, params2,
                                     activation="sigmoid", linear_num=1)
    assert jnp.allclose(out2, ref_out2, atol=1e-5, rtol=1e-5), "output mismatch (t2)"
    assert jnp.allclose(loss2, ref_loss2, atol=1e-5, rtol=1e-4), "loss mismatch (t2)"

    # --- test 3: linear_num=1, bf16 embedding streams, auto tile (ragged) ----
    B3, D3 = 24, 128
    kb = jax.random.split(jax.random.PRNGKey(2), 4)
    rep_a3 = jax.random.normal(kb[0], (B3, D3), jnp.float32).astype(jnp.bfloat16)
    rep_b3 = jax.random.normal(kb[1], (B3, D3), jnp.float32).astype(jnp.bfloat16)
    labels3 = jax.random.uniform(kb[2], (B3,), dtype=jnp.float32)
    params3 = {"w": linear_init(kb[3], D3, (D3, 1)), "b": linear_init(kb[3], D3, (1,))}
    loss3, out3 = custom_distance_mse_loss(rep_a3, rep_b3, labels3, params3,
                                           activation=None, linear_num=1)
    jax.block_until_ready((loss3, out3))
    ref_loss3, ref_out3 = _reference(rep_a3, rep_b3, labels3, params3,
                                     activation=None, linear_num=1)
    assert jnp.allclose(out3, ref_out3, atol=1e-4, rtol=1e-4), "output mismatch (t3)"
    assert jnp.allclose(loss3, ref_loss3, atol=1e-4, rtol=1e-3), "loss mismatch (t3)"

    # --- test 4: linear_num=2 (Linear->sigmoid->Linear), tanh, f32 MXU -------
    B4, D4 = 8, 32
    kk = jax.random.split(jax.random.PRNGKey(1), 8)
    rep_a4 = jax.random.normal(kk[0], (B4, D4), jnp.float32)
    rep_b4 = jax.random.normal(kk[1], (B4, D4), jnp.float32)
    labels4 = jax.random.uniform(kk[2], (B4,), dtype=jnp.float32)
    params4 = {"w1": linear_init(kk[3], D4, (D4, D4)),
               "b1": linear_init(kk[4], D4, (D4,)),
               "w2": linear_init(kk[5], D4, (D4, 1)),
               "b2": linear_init(kk[6], D4, (1,))}
    loss4, out4 = custom_distance_mse_loss(rep_a4, rep_b4, labels4, params4,
                                           activation="tanh", linear_num=2,
                                           mxu_bf16=False)
    jax.block_until_ready((loss4, out4))
    ref_loss4, ref_out4 = _reference(rep_a4, rep_b4, labels4, params4,
                                     activation="tanh", linear_num=2)
    assert jnp.allclose(out4, ref_out4, atol=1e-5, rtol=1e-5), "output mismatch (t4)"
    assert jnp.allclose(loss4, ref_loss4, atol=1e-5, rtol=1e-4), "loss mismatch (t4)"

    # --- test 5: linear_num=2 with bf16 MXU operands (default fast path) -----
    loss5, out5 = custom_distance_mse_loss(rep_a4, rep_b4, labels4, params4,
                                           activation="tanh", linear_num=2,
                                           mxu_bf16=True)
    jax.block_until_ready((loss5, out5))
    assert jnp.allclose(out5, ref_out4, atol=2e-2, rtol=2e-2), "output mismatch (t5)"
    assert jnp.allclose(loss5, ref_loss4, atol=2e-2, rtol=2e-2), "loss mismatch (t5)"

    print("KERNEL_OK")
</pallas_src>

<mosaic_0001>
module attributes {stable_mosaic.version = 11 : i64} {
  func.func @kernel(%arg0: i32, %arg1: memref<8x64xf32, #tpu.memory_space<vmem>>, %arg2: memref<8x64xf32, #tpu.memory_space<vmem>>, %arg3: memref<1x64xf32, #tpu.memory_space<vmem>>, %arg4: memref<1xf32, #tpu.memory_space<smem>>, %arg5: memref<8x1xf32, #tpu.memory_space<vmem>>) attributes {dimension_semantics = [#tpu.dimension_semantics<parallel>], iteration_bounds = array<i64: 1>, scalar_prefetch = 0 : i64, scratch_operands = 0 : i64, tpu.core_type = #tpu.core_type<tc>, window_params = [{transform_indices = @transform_0, window_bounds = array<i64: 8, 64>}, {transform_indices = @transform_1, window_bounds = array<i64: 8, 64>}, {pipeline_mode = #tpu.pipeline_mode<synchronous>, transform_indices = @transform_2, window_bounds = array<i64: 1, 64>}, {transform_indices = @transform_3, window_bounds = array<i64: 1>}, {transform_indices = @transform_4, window_bounds = array<i64: 8, 1>}]} {
    %c0 = arith.constant 0 : index
    %c0_0 = arith.constant 0 : index
    %0 = vector.load %arg1[%c0, %c0_0] : memref<8x64xf32, #tpu.memory_space<vmem>>, vector<8x64xf32>
    %c0_1 = arith.constant 0 : index
    %c0_2 = arith.constant 0 : index
    %1 = vector.load %arg2[%c0_1, %c0_2] : memref<8x64xf32, #tpu.memory_space<vmem>>, vector<8x64xf32>
    %2 = arith.subf %0, %1 : vector<8x64xf32>
    %3 = math.absf %2 : vector<8x64xf32>
    %c0_3 = arith.constant 0 : index
    %c0_4 = arith.constant 0 : index
    %4 = vector.load %arg3[%c0_3, %c0_4] : memref<1x64xf32, #tpu.memory_space<vmem>>, vector<1x64xf32>
    %5 = vector.broadcast %4 : vector<1x64xf32> to vector<8x64xf32>
    %6 = arith.mulf %3, %5 : vector<8x64xf32>
    %cst = arith.constant dense<0.000000e+00> : vector<8xf32>
    %7 = vector.multi_reduction <add>, %6, %cst [1] : vector<8x64xf32> to vector<8xf32>
    %8 = vector.shape_cast %7 : vector<8xf32> to vector<8x1xf32>
    %c0_5 = arith.constant 0 : index
    %9 = memref.load %arg4[%c0_5] : memref<1xf32, #tpu.memory_space<smem>>
    %10 = vector.broadcast %9 : f32 to vector<8x1xf32>
    %11 = arith.addf %8, %10 : vector<8x1xf32>
    %c0_6 = arith.constant 0 : index
    %c0_7 = arith.constant 0 : index
    %12 = vector.load %arg5[%c0_6, %c0_7] : memref<8x1xf32, #tpu.memory_space<vmem>>, vector<8x1xf32>
    tpu.vector_store %arg5[%c0_6, %c0_7], %11 {strides = array<i32>} : memref<8x1xf32, #tpu.memory_space<vmem>>, vector<8x1xf32>,
    return
  }
  func.func @transform_0(%arg0: i32) -> (i32, i32) {
    %c0_i32 = arith.constant 0 : i32
    %c0_i32_0 = arith.constant 0 : i32
    return %arg0, %c0_i32 : i32, i32
  }
  func.func @transform_1(%arg0: i32) -> (i32, i32) {
    %c0_i32 = arith.constant 0 : i32
    %c0_i32_0 = arith.constant 0 : i32
    return %arg0, %c0_i32 : i32, i32
  }
  func.func @transform_2(%arg0: i32) -> (i32, i32) {
    %c0_i32 = arith.constant 0 : i32
    %c0_i32_0 = arith.constant 0 : i32
    %c0_i32_1 = arith.constant 0 : i32
    return %c0_i32, %c0_i32_0 : i32, i32
  }
  func.func @transform_3(%arg0: i32) -> i32 {
    %c0_i32 = arith.constant 0 : i32
    %c0_i32_0 = arith.constant 0 : i32
    return %c0_i32 : i32
  }
  func.func @transform_4(%arg0: i32) -> (i32, i32) {
    %c0_i32 = arith.constant 0 : i32
    %c0_i32_0 = arith.constant 0 : i32
    return %arg0, %c0_i32 : i32, i32
  }
}

</mosaic_0001>

<bundles_post_ra>
// kernel: tpu_custom_call.1
= control target key start
LH: loop header
LB: loop body
LE: loop exit
PB: predicated region body
PF: predicated region fallthrough
CT: control target
= control target key end

     0   :  { %10 = vsyncpa [#allocation4], 0  ;;  %s180_s0 = inlined_call_operand.hbm [shape: f32[8,64], index: 0, kind: input, shape index: {}]   ;;  %s181_s1 = inlined_call_operand.hbm [shape: f32[8,64], index: 1, kind: input, shape index: {}]   ;;  %s182_s2 = inlined_call_operand.vmem [shape: f32[1,64], index: 2, kind: input, shape index: {}]   ;;  %s183_s3 = inlined_call_operand.<no memory space> [shape: f32[1], index: 3, kind: input, shape index: {}]   ;;  %s184_s4 = inlined_call_operand.vmem [shape: f32[8,1], index: 4, kind: output, shape index: {}]  }
   0x1   :  { %11 = vsyncpa [#allocation6], 0  ;;  %s120_s15 = smov [#allocation3]   ;;  %s121_s17 = smov [#allocation5]  }
   0x2   :  { %s18_s16 = sshll.u32 %s120_s15, 4  ;;  %s28_s18 = sshll.u32 %s121_s17, 4  ;;  %s19_s16 = int_to_ptr.vmem [resolvable:$true] %s18_s16  ;;  %s29_s18 = int_to_ptr.vmem [resolvable:$true] %s28_s18 }
   0x3   :  { %s72_s21 = scalar_lea.hbm %s180_s0, 128 }
   0x4   :  { %p73_p0 = scmp.ne.s32.totalorder %s180_s0, %s72_s21  ;;  %p76_p1 = scmp.lt.u32.totalorder %s72_s21, %s180_s0 }
   0x6   :  { %p78_p2 = pnand %p76_p1, %p73_p0 }
   0x8   :  { %81 = shalt.err (!%p78_p2)
}
   0x9   :  { %s82_s26 = scalar_lea.vmem %s19_s16, 128  ;;  %p87_p4 = scmp.lt.s32.totalorder %s19_s16, %s19_s16 }
   0xa   :  { %p83_p3 = scmp.ne.s32.totalorder %s19_s16, %s82_s26  ;;  %p88_p5 = scmp.lt.s32.totalorder %s82_s26, %s82_s26 }
   0xc   :  { %p89_p6 = por %p88_p5, %p87_p4 }
   0xe   :  { %p90_p7 = pnand %p89_p6, %p83_p3 }
  0x10   :  { %93 = shalt.err (!%p90_p7)
}
  0x11   :  { %21 = dma.hbm_to_vmem [thread:$0]  %s180_s0, 128, %s19_s16, [#allocation4]  }
  0x12   :  { %s94_s5 = scalar_lea.hbm %s181_s1, 128 }
  0x13   :  { %p95_p8 = scmp.ne.s32.totalorder %s181_s1, %s94_s5  ;;  %p98_p9 = scmp.lt.u32.totalorder %s94_s5, %s181_s1 }
  0x15   :  { %p100_p10 = pnand %p98_p9, %p95_p8 }
  0x17   :  { %103 = shalt.err (!%p100_p10)
}
  0x18   :  { %s104_s10 = scalar_lea.vmem %s29_s18, 128  ;;  %p109_p12 = scmp.lt.s32.totalorder %s29_s18, %s29_s18 }
  0x19   :  { %p105_p11 = scmp.ne.s32.totalorder %s29_s18, %s104_s10  ;;  %p110_p13 = scmp.lt.s32.totalorder %s104_s10, %s104_s10 }
  0x1b   :  { %p111_p0 = por %p110_p13, %p109_p12 }
  0x1d   :  { %p112_p1 = pnand %p111_p0, %p105_p11 }
  0x1f   :  { %115 = shalt.err (!%p112_p1)
}
  0x20   :  { %31 = dma.hbm_to_vmem [thread:$0]  %s181_s1, 128, %s29_s18, [#allocation6]  }
  0x21   :  { %116 = dma.done.wait [#allocation4], 128  }
  0x22   :  { %117 = vsyncadd [#allocation4], 4294967168 }
  0x23   :  { %118 = dma.done.wait [#allocation6], 128  }
  0x24   :  { %119 = vsyncadd [#allocation6], 4294967168  ;;  %v42_v0 = vld [vmem:[#allocation3] sm:$0xff]  ;;  %v43_v1 = vld [vmem:[#allocation5] sm:$0xff]  ;;  %vm54_vm0 = vcmask 523264   ;;  %v59_v7 = vstv %s183_s3  ;;  %vm61_vm1 = vcmask 7168  }
  0x25   :  { %v44_v2 = vsub.f32 %v42_v0, %v43_v1  ;;  %v69_v3 = vld [vmem:[%s182_s2] ss:$0 sm:$0xff] }
  0x27   :  { %v45_v4 = vand.u32 2147483647, %v44_v2 }
  0x29   :  { %v53_v5 = vmul.f32 %v69_v3, %v45_v4 }
  0x2b   :  { %v55_v6 = vsel %vm54_vm0, %v53_v5, 0.0 }
  0x2c   :  { %56 = vadd.xlane.f32.xlu0 %v55_v6 }
  0xb9   :  { %v57_v8 = vpop.xlane.xlu0 %56 }
  0xba   :  { %v60_v9 = vadd.f32 %v59_v7, %v57_v8 }
  0xbc   :  { %62 = vst.msk [vmem:[%s184_s4] sm:$0xff] %vm61_vm1, %v60_v9 }
  0xbd   :  { %67 = vsyncpa [#allocation4], 1 }
  0xbe   :  { %68 = vsyncpa [#allocation6], 1 }

</bundles_post_ra>
